<compile_context>
chip_gen: v6e
topology: v6e:2x2x1
jax: 0.10.0
libtpu: 0.0.40
codegen_flags: <defaults>
</compile_context>

<pallas_src>
import math

import numpy as np
import jax
import jax.numpy as jnp
from jax.experimental import pallas as pl
from jax.experimental.pallas import tpu as pltpu

LRELU = 0.2    # LeakyReLU negative slope (matches model.py)
EPS = 1e-5     # InstanceNorm2d default eps
LANE = 128     # TPU lane width


# ---------------------------------------------------------------------------
# Host-side (numpy) constant builders — executed once, reused every forward.
# ---------------------------------------------------------------------------
def _interp_matrix(n_in, n_out):
    """Bilinear 1-D interpolation matrix, align_corners=True (as in model.py)."""
    A = np.zeros((n_out, n_in), dtype=np.float32)
    for i in range(n_out):
        src = i * (n_in - 1) / (n_out - 1) if n_out > 1 else 0.0
        lo = min(int(np.floor(src)), n_in - 1)
        hi = min(lo + 1, n_in - 1)
        f = float(src - lo)
        A[i, lo] += 1.0 - f
        A[i, hi] += f
    return A


def _conv3x3_band_matrices_np(w, W):
    """w: np (3,3,Cin,Cout) -> (3, W*Cin, W*Cout) banded matrices M[dy] with
    conv3x3(x, pad=1)[y] = sum_dy x[y+dy-1] @ M[dy]  (rows outside [0,H) are 0).
    W-direction zero padding is folded in by clipping the band at the borders."""
    _, _, Cin, Cout = w.shape
    mats = np.zeros((3, W * Cin, W * Cout), np.float32)
    for dy in range(3):
        for dx in range(3):
            # s[u, x] = 1  iff  u == x + dx - 1  and  0 <= u < W  (border clip)
            s = np.eye(W, k=1 - dx, dtype=np.float32)
            mats[dy] += np.einsum("ux,ic->uixc", s, w[dy, dx]).reshape(
                W * Cin, W * Cout)
    return mats


def build_decoder_constants(params, H, W):
    """Builds every weight-derived matrix once (host numpy, item #9)."""
    convs = [wb for blk in params["blocks"] for wb in blk]     # 2*depth convs
    n_convs = len(convs)
    C = np.asarray(convs[0][0]).shape[2]
    WC = W * C

    m_all = np.zeros((n_convs * 3, WC, WC), np.float32)
    for ci, (w, _b) in enumerate(convs):
        m_all[3 * ci:3 * ci + 3] = _conv3x3_band_matrices_np(
            np.asarray(w, np.float32), W)

    # P[u*C+i, x*C+j] = (i==j) / (H*W): rowsum @ P == per-channel mean tiled.
    p_norm = (np.kron(np.ones((W, W), np.float32),
                      np.eye(C, dtype=np.float32)) / float(H * W))

    consts = {
        "H": H, "W": W, "C": C, "n_convs": n_convs,
        "upsample": bool(params["upsample"]),
        "m_all": jnp.asarray(m_all),
        "p_norm": jnp.asarray(p_norm),
    }

    if consts["upsample"]:
        w1 = np.asarray(params["w1x1"], np.float32)            # (C, Co)
        b1 = np.asarray(params["b1x1"], np.float32).reshape(-1)  # (Co,)
        Co = w1.shape[1]
        H2, W2 = 2 * H, 2 * W
        # Item #1: pad Co so the output lane width W2*Cp is a multiple of 128.
        step = LANE // math.gcd(W2, LANE)
        Cp = ((Co + step - 1) // step) * step
        w1p = np.zeros((C, Cp), np.float32); w1p[:, :Co] = w1
        b1p = np.zeros((Cp,), np.float32);   b1p[:Co] = b1

        # conv1x1 as block-diagonal over width, folded with width interp.
        B = np.einsum("xz,ic->xizc", np.eye(W, dtype=np.float32),
                      w1p).reshape(WC, W * Cp)
        aw = np.einsum("yx,ij->xiyj", _interp_matrix(W, W2),
                       np.eye(Cp, dtype=np.float32)).reshape(W * Cp, W2 * Cp)
        bw = B @ aw                                            # (WC, W2*Cp)
        bias_row = np.tile(b1p, W2).reshape(1, W2 * Cp)        # (1, W2*Cp)
        ah = _interp_matrix(H, H2)                             # (H2, H)

        consts.update({
            "Co": Co, "Cp": Cp,
            "bw": jnp.asarray(bw),
            "bias_row": jnp.asarray(bias_row),
            "ah_np": ah,            # kept as numpy: block-diag per Nb in wrapper
        })
    return consts


def _pick_batch_tile(N, H, max_rows=256):
    """Item #4: stack Nb samples per grid step along the matmul M axis while
    keeping >=2 grid steps when N>=2 (item #6, v7x megacore)."""
    nb = 1
    for cand in range(1, N + 1):
        if N % cand:
            continue
        if cand * H > max_rows:
            continue
        if N >= 2 and N // cand < 2:
            continue
        nb = cand
    return nb


# ---------------------------------------------------------------------------
# Fused decoder kernel (Nb batch samples, row-stacked, per grid step).
# ---------------------------------------------------------------------------
def make_decoder_kernel(H, n_convs, Nb, upsample):
    NbH = Nb * H

    def kernel(*refs):
        if upsample:
            if Nb > 1:
                (x_ref, m_ref, p_ref, seg_ref, segT_ref,
                 bw_ref, bias_ref, ah_ref, o_ref) = refs
            else:
                x_ref, m_ref, p_ref, bw_ref, bias_ref, ah_ref, o_ref = refs
        else:
            if Nb > 1:
                x_ref, m_ref, p_ref, seg_ref, segT_ref, o_ref = refs
            else:
                x_ref, m_ref, p_ref, o_ref = refs

        p = p_ref[...]                                   # (WC, WC)

        # Border-row masks for the H-direction zero padding of conv3x3(pad=1).
        rows = jax.lax.broadcasted_iota(jnp.int32, (NbH, 1), 0)
        rin = rows % H                                   # row within each sample
        not_top = (rin != 0).astype(jnp.float32)         # gates the y-1 term
        not_bot = (rin != H - 1).astype(jnp.float32)     # gates the y+1 term

        y = x_ref[...]                                   # (NbH, WC) lane-dense slab
        for blk in range(n_convs):
            # --- conv3x3(pad=1): 3 aligned whole-slab matmuls + sublane rolls
            p0 = jnp.dot(y, m_ref[3 * blk + 0], preferred_element_type=jnp.float32)
            p1 = jnp.dot(y, m_ref[3 * blk + 1], preferred_element_type=jnp.float32)
            p2 = jnp.dot(y, m_ref[3 * blk + 2], preferred_element_type=jnp.float32)
            acc = (p1
                   + not_top * pltpu.roll(p0, shift=1, axis=0)          # row y-1
                   + not_bot * pltpu.roll(p2, shift=NbH - 1, axis=0))   # row y+1
            # Conv bias omitted: cancelled exactly by the InstanceNorm mean sub.

            # --- InstanceNorm2d (affine=False, biased variance): rowsum @ P --
            if Nb == 1:
                rs = jnp.sum(acc, axis=0, keepdims=True)                # (1, WC)
                mean_t = jnp.dot(rs, p, preferred_element_type=jnp.float32)
                d = acc - mean_t
                vs = jnp.sum(d * d, axis=0, keepdims=True)
                var_t = jnp.dot(vs, p, preferred_element_type=jnp.float32)
                yn = d * jax.lax.rsqrt(var_t + EPS)
            else:
                # Per-sample stats via the (Nb, Nb*H) segment-sum matrix.
                seg = seg_ref[...]                                       # (Nb, NbH)
                segT = segT_ref[...]                                     # (NbH, Nb)
                rs = jnp.dot(seg, acc, preferred_element_type=jnp.float32)
                mean_t = jnp.dot(rs, p, preferred_element_type=jnp.float32)
                d = acc - jnp.dot(segT, mean_t, preferred_element_type=jnp.float32)
                vs = jnp.dot(seg, d * d, preferred_element_type=jnp.float32)
                var_t = jnp.dot(vs, p, preferred_element_type=jnp.float32)
                yn = d * jnp.dot(segT, jax.lax.rsqrt(var_t + EPS),
                                 preferred_element_type=jnp.float32)
            # --- LeakyReLU(0.2) ---------------------------------------------
            y = jnp.where(yn >= 0.0, yn, LRELU * yn)

        if upsample:
            # conv1x1 (channel-padded to Cp) folded with the bilinear width
            # interp (bw); bias passes through the height interp exactly.
            z = jnp.dot(y, bw_ref[...], preferred_element_type=jnp.float32)
            z = z + bias_ref[...]
            o_ref[...] = jnp.dot(ah_ref[...], z,
                                 preferred_element_type=jnp.float32)
        else:
            o_ref[...] = y

    return kernel


# ---------------------------------------------------------------------------
# Decoder: params init + forward (public interface is PyTorch NCHW).
# ---------------------------------------------------------------------------
def init_decoder_params(key, channels, out_channel, depth=1):
    params = {"blocks": [], "upsample": out_channel != channels}
    for _ in range(depth):
        blk = []
        for _ in range(2):  # two BasicBlocks per depth level
            key, k1, k2 = jax.random.split(key, 3)
            fan_in = channels * 9
            w = jax.random.normal(k1, (3, 3, channels, channels),
                                  jnp.float32) / np.sqrt(fan_in)
            # Conv bias exists in PyTorch (bias=True) but is a mathematical
            # no-op through InstanceNorm2d; kept for parameter fidelity only.
            b = jax.random.normal(k2, (1, channels), jnp.float32) * 0.1
            blk.append((w, b))
        params["blocks"].append(blk)
    if params["upsample"]:
        key, k1, k2 = jax.random.split(key, 3)
        params["w1x1"] = jax.random.normal(
            k1, (channels, out_channel), jnp.float32) / np.sqrt(channels)
        params["b1x1"] = jax.random.normal(k2, (1, out_channel), jnp.float32) * 0.1
    return params


def decoder_forward(consts, x_nchw, nb=None):
    x = x_nchw.astype(jnp.float32)
    N, C, H, W = x.shape
    assert (C, H, W) == (consts["C"], consts["H"], consts["W"])
    WC = W * C
    upsample = consts["upsample"]
    n_convs = consts["n_convs"]

    Nb = nb if nb is not None else _pick_batch_tile(N, H)
    assert N % Nb == 0
    G = N // Nb
    NbH = Nb * H

    # NCHW -> lane-dense, row-stacked (N*H, W*C) slab (samples along M axis).
    x_slab = jnp.transpose(x, (0, 2, 3, 1)).reshape(N * H, WC)

    args = [x_slab, consts["m_all"], consts["p_norm"]]
    in_specs = [
        pl.BlockSpec((NbH, WC), lambda g: (g, 0)),
        pl.BlockSpec((n_convs * 3, WC, WC), lambda g: (0, 0, 0)),
        pl.BlockSpec((WC, WC), lambda g: (0, 0)),
    ]
    if Nb > 1:
        seg_np = np.kron(np.eye(Nb, dtype=np.float32),
                         np.ones((1, H), np.float32))          # (Nb, Nb*H)
        args += [jnp.asarray(seg_np), jnp.asarray(seg_np.T)]
        in_specs += [pl.BlockSpec((Nb, NbH), lambda g: (0, 0)),
                     pl.BlockSpec((NbH, Nb), lambda g: (0, 0))]

    if upsample:
        Co, Cp = consts["Co"], consts["Cp"]
        H2, W2 = 2 * H, 2 * W
        ah_blk = jnp.asarray(np.kron(np.eye(Nb, dtype=np.float32),
                                     consts["ah_np"]))          # (Nb*H2, Nb*H)
        args += [consts["bw"], consts["bias_row"], ah_blk]
        in_specs += [pl.BlockSpec((WC, W2 * Cp), lambda g: (0, 0)),
                     pl.BlockSpec((1, W2 * Cp), lambda g: (0, 0)),
                     pl.BlockSpec((Nb * H2, NbH), lambda g: (0, 0))]
        out_shape = jax.ShapeDtypeStruct((N * H2, W2 * Cp), jnp.float32)
        out_spec = pl.BlockSpec((Nb * H2, W2 * Cp), lambda g: (g, 0))
    else:
        out_shape = jax.ShapeDtypeStruct((N * H, WC), jnp.float32)
        out_spec = pl.BlockSpec((NbH, WC), lambda g: (g, 0))

    kernel = make_decoder_kernel(H, n_convs, Nb, upsample)
    out = pl.pallas_call(
        kernel,
        out_shape=out_shape,
        grid=(G,),
        in_specs=in_specs,
        out_specs=out_spec,
        compiler_params=pltpu.CompilerParams(
            dimension_semantics=("parallel",),
            vmem_limit_bytes=32 * 1024 * 1024),
    )(*args)

    if upsample:
        Co, Cp = consts["Co"], consts["Cp"]
        H2, W2 = 2 * H, 2 * W
        out = out.reshape(N, H2, W2, Cp)[..., :Co]   # drop lane-padding channels
        return out.transpose(0, 3, 1, 2)
    return out.reshape(N, H, W, C).transpose(0, 3, 1, 2)


# ---------------------------------------------------------------------------
# Pure-JAX reference (for correctness check only).
# ---------------------------------------------------------------------------
def _reference_forward(params, x_nchw):
    hp = jax.lax.Precision.HIGHEST
    x = jnp.transpose(x_nchw, (0, 2, 3, 1)).astype(jnp.float32)   # NHWC
    for blk in params["blocks"]:
        for (w, b) in blk:
            y = jax.lax.conv_general_dilated(
                x, w, window_strides=(1, 1), padding="SAME",
                dimension_numbers=("NHWC", "HWIO", "NHWC"),
                precision=hp) + b.reshape(1, 1, 1, -1)
            mean = jnp.mean(y, axis=(1, 2), keepdims=True)
            var = jnp.mean((y - mean) ** 2, axis=(1, 2), keepdims=True)
            y = (y - mean) * jax.lax.rsqrt(var + EPS)
            x = jnp.where(y >= 0.0, y, LRELU * y)
    if params["upsample"]:
        x = jnp.einsum("nhwc,co->nhwo", x, params["w1x1"],
                       precision=hp) + params["b1x1"].reshape(1, 1, 1, -1)
        H, W = x.shape[1], x.shape[2]
        ah = jnp.asarray(_interp_matrix(H, 2 * H))
        aw = jnp.asarray(_interp_matrix(W, 2 * W))
        x = jnp.einsum("ph,nhwc->npwc", ah, x, precision=hp)
        x = jnp.einsum("qw,npwc->npqc", aw, x, precision=hp)
    return jnp.transpose(x, (0, 3, 1, 2))


if __name__ == "__main__":
    key = jax.random.PRNGKey(0)
    k_x, k_p = jax.random.split(key)

    N, channels, out_channel, H, W = 2, 4, 3, 16, 16
    x = jax.random.normal(k_x, (N, channels, H, W), jnp.float32)   # NCHW input

    params = init_decoder_params(k_p, channels, out_channel, depth=1)
    consts = build_decoder_constants(params, H, W)   # built once, reused (#9)

    # Primary check: N=2 -> Nb=1, grid=(2,) ("parallel": one step per v7x core).
    out = jax.block_until_ready(decoder_forward(consts, x))
    expected_shape = (N, out_channel, 2 * H, 2 * W)
    assert out.shape == expected_shape, (out.shape, expected_shape)
    assert bool(jnp.all(jnp.isfinite(out)))
    ref = jax.block_until_ready(_reference_forward(params, x))
    np.testing.assert_allclose(np.asarray(out), np.asarray(ref),
                               rtol=2e-2, atol=2e-2)

    # Secondary check: exercise the batched (Nb=2) M-axis stacking path (#4).
    x4 = jax.random.normal(jax.random.split(k_x)[0],
                           (4, channels, H, W), jnp.float32)
    out4 = jax.block_until_ready(decoder_forward(consts, x4, nb=2))
    assert out4.shape == (4, out_channel, 2 * H, 2 * W)
    ref4 = jax.block_until_ready(_reference_forward(params, x4))
    np.testing.assert_allclose(np.asarray(out4), np.asarray(ref4),
                               rtol=2e-2, atol=2e-2)

    print("KERNEL_OK")
</pallas_src>

<mosaic_0001>
module attributes {stable_mosaic.version = 11 : i64} {
  func.func @kernel(%arg0: i32, %arg1: memref<16x64xf32, #tpu.memory_space<vmem>>, %arg2: memref<6x64x64xf32, #tpu.memory_space<vmem>>, %arg3: memref<64x64xf32, #tpu.memory_space<vmem>>, %arg4: memref<64x128xf32, #tpu.memory_space<vmem>>, %arg5: memref<1x128xf32, #tpu.memory_space<vmem>>, %arg6: memref<32x16xf32, #tpu.memory_space<vmem>>, %arg7: memref<32x128xf32, #tpu.memory_space<vmem>>) attributes {dimension_semantics = [#tpu.dimension_semantics<parallel>], iteration_bounds = array<i64: 2>, scalar_prefetch = 0 : i64, scratch_operands = 0 : i64, tpu.core_type = #tpu.core_type<tc>, window_params = [{transform_indices = @transform_0, window_bounds = array<i64: 16, 64>}, {pipeline_mode = #tpu.pipeline_mode<synchronous>, transform_indices = @transform_1, window_bounds = array<i64: 6, 64, 64>}, {pipeline_mode = #tpu.pipeline_mode<synchronous>, transform_indices = @transform_2, window_bounds = array<i64: 64, 64>}, {pipeline_mode = #tpu.pipeline_mode<synchronous>, transform_indices = @transform_3, window_bounds = array<i64: 64, 128>}, {pipeline_mode = #tpu.pipeline_mode<synchronous>, transform_indices = @transform_4, window_bounds = array<i64: 1, 128>}, {pipeline_mode = #tpu.pipeline_mode<synchronous>, transform_indices = @transform_5, window_bounds = array<i64: 32, 16>}, {transform_indices = @transform_6, window_bounds = array<i64: 32, 128>}]} {
    %c0 = arith.constant 0 : index
    %c0_0 = arith.constant 0 : index
    %0 = vector.load %arg3[%c0, %c0_0] : memref<64x64xf32, #tpu.memory_space<vmem>>, vector<64x64xf32>
    %1 = tpu.iota {dimensions = array<i32: 0>} : vector<16x1xi32>
    %c16_i32 = arith.constant 16 : i32
    %c0_i32 = arith.constant 0 : i32
    %2 = arith.cmpi eq, %c16_i32, %c0_i32 : i32
    %c1_i32 = arith.constant 1 : i32
    %3 = arith.select %2, %c1_i32, %c16_i32 : i32
    %4 = vector.broadcast %3 : i32 to vector<16x1xi32>
    %5 = arith.remsi %1, %4 : vector<16x1xi32>
    %c0_i32_1 = arith.constant 0 : i32
    %6 = vector.broadcast %c0_i32_1 : i32 to vector<16x1xi32>
    %7 = arith.cmpi ne, %5, %6 : vector<16x1xi32>
    %c0_i32_2 = arith.constant 0 : i32
    %8 = vector.broadcast %c0_i32_2 : i32 to vector<16x1xi32>
    %9 = arith.cmpi slt, %5, %8 : vector<16x1xi32>
    %c0_i32_3 = arith.constant 0 : i32
    %10 = arith.cmpi slt, %3, %c0_i32_3 : i32
    %11 = vector.broadcast %10 : i1 to vector<16x1xi1>
    %12 = vector.broadcast %11 : vector<16x1xi1> to vector<16x1xi1>
    %13 = arith.xori %9, %12 : vector<16x1xi1>
    %14 = arith.andi %13, %7 : vector<16x1xi1>
    %15 = vector.broadcast %3 : i32 to vector<16x1xi32>
    %16 = arith.addi %5, %15 : vector<16x1xi32>
    %17 = arith.select %14, %16, %5 : vector<16x1xi1>, vector<16x1xi32>
    %c0_i32_4 = arith.constant 0 : i32
    %18 = vector.broadcast %c0_i32_4 : i32 to vector<16x1xi32>
    %19 = arith.cmpi ne, %17, %18 : vector<16x1xi32>
    %20 = arith.extui %19 : vector<16x1xi1> to vector<16x1xi32>
    %21 = arith.sitofp %20 : vector<16x1xi32> to vector<16x1xf32>
    %c15_i32 = arith.constant 15 : i32
    %22 = vector.broadcast %c15_i32 : i32 to vector<16x1xi32>
    %23 = arith.cmpi ne, %17, %22 : vector<16x1xi32>
    %24 = arith.extui %23 : vector<16x1xi1> to vector<16x1xi32>
    %25 = arith.sitofp %24 : vector<16x1xi32> to vector<16x1xf32>
    %c0_5 = arith.constant 0 : index
    %c0_6 = arith.constant 0 : index
    %26 = vector.load %arg1[%c0_5, %c0_6] : memref<16x64xf32, #tpu.memory_space<vmem>>, vector<16x64xf32>
    %c0_7 = arith.constant 0 : index
    %c0_8 = arith.constant 0 : index
    %c0_9 = arith.constant 0 : index
    %27 = vector.load %arg2[%c0_7, %c0_8, %c0_9] : memref<6x64x64xf32, #tpu.memory_space<vmem>>, vector<1x64x64xf32>
    %28 = vector.shape_cast %27 : vector<1x64x64xf32> to vector<64x64xf32>
    %cst = arith.constant dense<0.000000e+00> : vector<16x64xf32>
    %29 = tpu.matmul %26, %28, %cst {dimension_numbers = #tpu.dot_dimension_numbers<[1], [0], [0], [1], [0, 0, 1, 1], [], []>} : vector<16x64xf32>, vector<64x64xf32>, vector<16x64xf32> -> vector<16x64xf32>
    %c1 = arith.constant 1 : index
    %c0_10 = arith.constant 0 : index
    %c0_11 = arith.constant 0 : index
    %30 = vector.load %arg2[%c1, %c0_10, %c0_11] : memref<6x64x64xf32, #tpu.memory_space<vmem>>, vector<1x64x64xf32>
    %31 = vector.shape_cast %30 : vector<1x64x64xf32> to vector<64x64xf32>
    %cst_12 = arith.constant dense<0.000000e+00> : vector<16x64xf32>
    %32 = tpu.matmul %26, %31, %cst_12 {dimension_numbers = #tpu.dot_dimension_numbers<[1], [0], [0], [1], [0, 0, 1, 1], [], []>} : vector<16x64xf32>, vector<64x64xf32>, vector<16x64xf32> -> vector<16x64xf32>
    %c2 = arith.constant 2 : index
    %c0_13 = arith.constant 0 : index
    %c0_14 = arith.constant 0 : index
    %33 = vector.load %arg2[%c2, %c0_13, %c0_14] : memref<6x64x64xf32, #tpu.memory_space<vmem>>, vector<1x64x64xf32>
    %34 = vector.shape_cast %33 : vector<1x64x64xf32> to vector<64x64xf32>
    %cst_15 = arith.constant dense<0.000000e+00> : vector<16x64xf32>
    %35 = tpu.matmul %26, %34, %cst_15 {dimension_numbers = #tpu.dot_dimension_numbers<[1], [0], [0], [1], [0, 0, 1, 1], [], []>} : vector<16x64xf32>, vector<64x64xf32>, vector<16x64xf32> -> vector<16x64xf32>
    %c1_i32_16 = arith.constant 1 : i32
    %36 = tpu.dynamic_rotate %29 by %c1_i32_16 dim 0 : vector<16x64xf32>, i32 -> vector<16x64xf32>
    %37 = vector.broadcast %21 : vector<16x1xf32> to vector<16x64xf32>
    %38 = arith.mulf %37, %36 : vector<16x64xf32>
    %39 = arith.addf %32, %38 : vector<16x64xf32>
    %c15_i32_17 = arith.constant 15 : i32
    %40 = tpu.dynamic_rotate %35 by %c15_i32_17 dim 0 : vector<16x64xf32>, i32 -> vector<16x64xf32>
    %41 = vector.broadcast %25 : vector<16x1xf32> to vector<16x64xf32>
    %42 = arith.mulf %41, %40 : vector<16x64xf32>
    %43 = arith.addf %39, %42 : vector<16x64xf32>
    %cst_18 = arith.constant dense<0.000000e+00> : vector<64xf32>
    %44 = vector.multi_reduction <add>, %43, %cst_18 [0] : vector<16x64xf32> to vector<64xf32>
    %45 = vector.shape_cast %44 : vector<64xf32> to vector<1x64xf32>
    %cst_19 = arith.constant dense<0.000000e+00> : vector<1x64xf32>
    %46 = tpu.matmul %45, %0, %cst_19 {dimension_numbers = #tpu.dot_dimension_numbers<[1], [0], [0], [1], [0, 0, 1, 1], [], []>} : vector<1x64xf32>, vector<64x64xf32>, vector<1x64xf32> -> vector<1x64xf32>
    %47 = vector.broadcast %46 : vector<1x64xf32> to vector<16x64xf32>
    %48 = arith.subf %43, %47 : vector<16x64xf32>
    %49 = arith.mulf %48, %48 : vector<16x64xf32>
    %cst_20 = arith.constant dense<0.000000e+00> : vector<64xf32>
    %50 = vector.multi_reduction <add>, %49, %cst_20 [0] : vector<16x64xf32> to vector<64xf32>
    %51 = vector.shape_cast %50 : vector<64xf32> to vector<1x64xf32>
    %cst_21 = arith.constant dense<0.000000e+00> : vector<1x64xf32>
    %52 = tpu.matmul %51, %0, %cst_21 {dimension_numbers = #tpu.dot_dimension_numbers<[1], [0], [0], [1], [0, 0, 1, 1], [], []>} : vector<1x64xf32>, vector<64x64xf32>, vector<1x64xf32> -> vector<1x64xf32>
    %cst_22 = arith.constant 9.99999974E-6 : f32
    %53 = vector.broadcast %cst_22 : f32 to vector<1x64xf32>
    %54 = arith.addf %52, %53 : vector<1x64xf32>
    %55 = math.rsqrt %54 : vector<1x64xf32>
    %56 = vector.broadcast %55 : vector<1x64xf32> to vector<16x64xf32>
    %57 = arith.mulf %48, %56 : vector<16x64xf32>
    %cst_23 = arith.constant 0.000000e+00 : f32
    %58 = vector.broadcast %cst_23 : f32 to vector<16x64xf32>
    %59 = arith.cmpf oge, %57, %58 : vector<16x64xf32>
    %cst_24 = arith.constant 2.000000e-01 : f32
    %60 = vector.broadcast %cst_24 : f32 to vector<16x64xf32>
    %61 = arith.mulf %60, %57 : vector<16x64xf32>
    %62 = arith.select %59, %57, %61 : vector<16x64xi1>, vector<16x64xf32>
    %c3 = arith.constant 3 : index
    %c0_25 = arith.constant 0 : index
    %c0_26 = arith.constant 0 : index
    %63 = vector.load %arg2[%c3, %c0_25, %c0_26] : memref<6x64x64xf32, #tpu.memory_space<vmem>>, vector<1x64x64xf32>
    %64 = vector.shape_cast %63 : vector<1x64x64xf32> to vector<64x64xf32>
    %cst_27 = arith.constant dense<0.000000e+00> : vector<16x64xf32>
    %65 = tpu.matmul %62, %64, %cst_27 {dimension_numbers = #tpu.dot_dimension_numbers<[1], [0], [0], [1], [0, 0, 1, 1], [], []>} : vector<16x64xf32>, vector<64x64xf32>, vector<16x64xf32> -> vector<16x64xf32>
    %c4 = arith.constant 4 : index
    %c0_28 = arith.constant 0 : index
    %c0_29 = arith.constant 0 : index
    %66 = vector.load %arg2[%c4, %c0_28, %c0_29] : memref<6x64x64xf32, #tpu.memory_space<vmem>>, vector<1x64x64xf32>
    %67 = vector.shape_cast %66 : vector<1x64x64xf32> to vector<64x64xf32>
    %cst_30 = arith.constant dense<0.000000e+00> : vector<16x64xf32>
    %68 = tpu.matmul %62, %67, %cst_30 {dimension_numbers = #tpu.dot_dimension_numbers<[1], [0], [0], [1], [0, 0, 1, 1], [], []>} : vector<16x64xf32>, vector<64x64xf32>, vector<16x64xf32> -> vector<16x64xf32>
    %c5 = arith.constant 5 : index
    %c0_31 = arith.constant 0 : index
    %c0_32 = arith.constant 0 : index
    %69 = vector.load %arg2[%c5, %c0_31, %c0_32] : memref<6x64x64xf32, #tpu.memory_space<vmem>>, vector<1x64x64xf32>
    %70 = vector.shape_cast %69 : vector<1x64x64xf32> to vector<64x64xf32>
    %cst_33 = arith.constant dense<0.000000e+00> : vector<16x64xf32>
    %71 = tpu.matmul %62, %70, %cst_33 {dimension_numbers = #tpu.dot_dimension_numbers<[1], [0], [0], [1], [0, 0, 1, 1], [], []>} : vector<16x64xf32>, vector<64x64xf32>, vector<16x64xf32> -> vector<16x64xf32>
    %c1_i32_34 = arith.constant 1 : i32
    %72 = tpu.dynamic_rotate %65 by %c1_i32_34 dim 0 : vector<16x64xf32>, i32 -> vector<16x64xf32>
    %73 = vector.broadcast %21 : vector<16x1xf32> to vector<16x64xf32>
    %74 = arith.mulf %73, %72 : vector<16x64xf32>
    %75 = arith.addf %68, %74 : vector<16x64xf32>
    %c15_i32_35 = arith.constant 15 : i32
    %76 = tpu.dynamic_rotate %71 by %c15_i32_35 dim 0 : vector<16x64xf32>, i32 -> vector<16x64xf32>
    %77 = vector.broadcast %25 : vector<16x1xf32> to vector<16x64xf32>
    %78 = arith.mulf %77, %76 : vector<16x64xf32>
    %79 = arith.addf %75, %78 : vector<16x64xf32>
    %cst_36 = arith.constant dense<0.000000e+00> : vector<64xf32>
    %80 = vector.multi_reduction <add>, %79, %cst_36 [0] : vector<16x64xf32> to vector<64xf32>
    %81 = vector.shape_cast %80 : vector<64xf32> to vector<1x64xf32>
    %cst_37 = arith.constant dense<0.000000e+00> : vector<1x64xf32>
    %82 = tpu.matmul %81, %0, %cst_37 {dimension_numbers = #tpu.dot_dimension_numbers<[1], [0], [0], [1], [0, 0, 1, 1], [], []>} : vector<1x64xf32>, vector<64x64xf32>, vector<1x64xf32> -> vector<1x64xf32>
    %83 = vector.broadcast %82 : vector<1x64xf32> to vector<16x64xf32>
    %84 = arith.subf %79, %83 : vector<16x64xf32>
    %85 = arith.mulf %84, %84 : vector<16x64xf32>
    %cst_38 = arith.constant dense<0.000000e+00> : vector<64xf32>
    %86 = vector.multi_reduction <add>, %85, %cst_38 [0] : vector<16x64xf32> to vector<64xf32>
    %87 = vector.shape_cast %86 : vector<64xf32> to vector<1x64xf32>
    %cst_39 = arith.constant dense<0.000000e+00> : vector<1x64xf32>
    %88 = tpu.matmul %87, %0, %cst_39 {dimension_numbers = #tpu.dot_dimension_numbers<[1], [0], [0], [1], [0, 0, 1, 1], [], []>} : vector<1x64xf32>, vector<64x64xf32>, vector<1x64xf32> -> vector<1x64xf32>
    %cst_40 = arith.constant 9.99999974E-6 : f32
    %89 = vector.broadcast %cst_40 : f32 to vector<1x64xf32>
    %90 = arith.addf %88, %89 : vector<1x64xf32>
    %91 = math.rsqrt %90 : vector<1x64xf32>
    %92 = vector.broadcast %91 : vector<1x64xf32> to vector<16x64xf32>
    %93 = arith.mulf %84, %92 : vector<16x64xf32>
    %cst_41 = arith.constant 0.000000e+00 : f32
    %94 = vector.broadcast %cst_41 : f32 to vector<16x64xf32>
    %95 = arith.cmpf oge, %93, %94 : vector<16x64xf32>
    %cst_42 = arith.constant 2.000000e-01 : f32
    %96 = vector.broadcast %cst_42 : f32 to vector<16x64xf32>
    %97 = arith.mulf %96, %93 : vector<16x64xf32>
    %98 = arith.select %95, %93, %97 : vector<16x64xi1>, vector<16x64xf32>
    %c0_43 = arith.constant 0 : index
    %c0_44 = arith.constant 0 : index
    %99 = vector.load %arg4[%c0_43, %c0_44] : memref<64x128xf32, #tpu.memory_space<vmem>>, vector<64x128xf32>
    %cst_45 = arith.constant dense<0.000000e+00> : vector<16x128xf32>
    %100 = tpu.matmul %98, %99, %cst_45 {dimension_numbers = #tpu.dot_dimension_numbers<[1], [0], [0], [1], [0, 0, 1, 1], [], []>} : vector<16x64xf32>, vector<64x128xf32>, vector<16x128xf32> -> vector<16x128xf32>
    %c0_46 = arith.constant 0 : index
    %c0_47 = arith.constant 0 : index
    %101 = vector.load %arg5[%c0_46, %c0_47] : memref<1x128xf32, #tpu.memory_space<vmem>>, vector<1x128xf32>
    %102 = vector.broadcast %101 : vector<1x128xf32> to vector<16x128xf32>
    %103 = arith.addf %100, %102 : vector<16x128xf32>
    %c0_48 = arith.constant 0 : index
    %c0_49 = arith.constant 0 : index
    %104 = vector.load %arg6[%c0_48, %c0_49] : memref<32x16xf32, #tpu.memory_space<vmem>>, vector<32x16xf32>
    %cst_50 = arith.constant dense<0.000000e+00> : vector<32x128xf32>
    %105 = tpu.matmul %104, %103, %cst_50 {dimension_numbers = #tpu.dot_dimension_numbers<[1], [0], [0], [1], [0, 0, 1, 1], [], []>} : vector<32x16xf32>, vector<16x128xf32>, vector<32x128xf32> -> vector<32x128xf32>
    %c0_51 = arith.constant 0 : index
    %c0_52 = arith.constant 0 : index
    %106 = vector.load %arg7[%c0_51, %c0_52] : memref<32x128xf32, #tpu.memory_space<vmem>>, vector<32x128xf32>
    tpu.vector_store %arg7[%c0_51, %c0_52], %105 {strides = array<i32>} : memref<32x128xf32, #tpu.memory_space<vmem>>, vector<32x128xf32>,
    return
  }
  func.func @transform_0(%arg0: i32) -> (i32, i32) {
    %c0_i32 = arith.constant 0 : i32
    %c0_i32_0 = arith.constant 0 : i32
    return %arg0, %c0_i32 : i32, i32
  }
  func.func @transform_1(%arg0: i32) -> (i32, i32, i32) {
    %c0_i32 = arith.constant 0 : i32
    %c0_i32_0 = arith.constant 0 : i32
    %c0_i32_1 = arith.constant 0 : i32
    %c0_i32_2 = arith.constant 0 : i32
    return %c0_i32, %c0_i32_0, %c0_i32_1 : i32, i32, i32
  }
  func.func @transform_2(%arg0: i32) -> (i32, i32) {
    %c0_i32 = arith.constant 0 : i32
    %c0_i32_0 = arith.constant 0 : i32
    %c0_i32_1 = arith.constant 0 : i32
    return %c0_i32, %c0_i32_0 : i32, i32
  }
  func.func @transform_3(%arg0: i32) -> (i32, i32) {
    %c0_i32 = arith.constant 0 : i32
    %c0_i32_0 = arith.constant 0 : i32
    %c0_i32_1 = arith.constant 0 : i32
    return %c0_i32, %c0_i32_0 : i32, i32
  }
  func.func @transform_4(%arg0: i32) -> (i32, i32) {
    %c0_i32 = arith.constant 0 : i32
    %c0_i32_0 = arith.constant 0 : i32
    %c0_i32_1 = arith.constant 0 : i32
    return %c0_i32, %c0_i32_0 : i32, i32
  }
  func.func @transform_5(%arg0: i32) -> (i32, i32) {
    %c0_i32 = arith.constant 0 : i32
    %c0_i32_0 = arith.constant 0 : i32
    %c0_i32_1 = arith.constant 0 : i32
    return %c0_i32, %c0_i32_0 : i32, i32
  }
  func.func @transform_6(%arg0: i32) -> (i32, i32) {
    %c0_i32 = arith.constant 0 : i32
    %c0_i32_0 = arith.constant 0 : i32
    return %arg0, %c0_i32 : i32, i32
  }
}

</mosaic_0001>

<bundles_post_ra>
// kernel: tpu_custom_call.1
= control target key start
LH: loop header
LB: loop body
LE: loop exit
PB: predicated region body
PF: predicated region fallthrough
CT: control target
= control target key end

     0   :  { %11 = vsyncpa [#allocation3], 0  ;;  %s2555_s0 = inlined_call_operand.vmem [shape: f32[32,64], index: 0, kind: input, shape index: {}]   ;;  %s2556_s1 = inlined_call_operand.hbm [shape: f32[6,64,64], index: 1, kind: input, shape index: {}]   ;;  %s2557_s2 = inlined_call_operand.hbm [shape: f32[64,64], index: 2, kind: input, shape index: {}]   ;;  %s2558_s3 = inlined_call_operand.hbm [shape: f32[64,128], index: 3, kind: input, shape index: {}]   ;;  %s2559_s4 = inlined_call_operand.vmem [shape: f32[1,128], index: 4, kind: input, shape index: {}]   ;;  %s2560_s5 = inlined_call_operand.vmem [shape: f32[32,16], index: 5, kind: input, shape index: {}]   ;;  %s2561_s6 = inlined_call_operand.hbm [shape: f32[64,128], index: 6, kind: output, shape index: {}]  }
   0x1   :  { %12 = vsyncpa [#allocation6], 0 }
   0x2   :  { %13 = vsyncpa [#allocation4], 0 }
   0x3   :  { %15 = vsyncpa [#allocation4 + $0x1], 0  ;;  %s2219_s21 = smov 0   ;;  %s2221_s22 = smov 0  }
   0x4   :  { %s2223_s23 = smov 0   ;;  %s2225_s24 = smov 0  }
   0x5 LB: > { %s2240_s25 = sadd.s32 4294967295, %s2172_s24   ;;  %s1571_s26 = sadd.s32 4294967294, %s2172_s24   ;;  %s2172_s24 = sphi %s2225_s24, %s2577_s24   ;;  %s2168_s23 = sphi %s2223_s23, %s2576_s23   ;;  %s2164_s22 = sphi %s2221_s22, %s2575_s22   ;;  %s2160_s21 = sphi %s2219_s21, %s2574_s21  }
   0x6   : > { %s2244_s27 = sadd.s32 1, %s2172_s24   ;;  %s159_s28 = sadd.s32 1, %s2168_s23 }
   0x7   : > { %s156_s29 = ssub.s32 %s2172_s24, %s2244_s27  ;;  %p169_p0 = scmp.ne.s32.totalorder %s2168_s23, %s2164_s22 }
   0x8   : > { %p157_p1 = scmp.eq.s32.totalorder %s156_s29, 0  ;;  %p170_p2 = scmp.eq.s32.totalorder %s2240_s25, 1 }
   0x9   : > { %p175_p3 = scmp.ne.s32.totalorder %s2164_s22, %s2160_s21  ;;  %p176_p4 = scmp.eq.s32.totalorder %s1571_s26, 1 }
   0xa   : > { %s2255_s30 = scalar_select %p157_p1, %s2168_s23, %s159_s28  }
   0xb   : > { %p2257_p5 = por %p170_p2, %p169_p0  ;;  %p2261_p6 = por %p176_p4, %p175_p3 }
   0xc   : > { %p1572_p7 = scmp.ge.s32.totalorder %s2172_s24, 1  ;;  %p183_p8 = scmp.lt.s32.totalorder %s2172_s24, 3 }
   0xd   : > { %s2564_s7 = scalar_select %p2257_p5, 1, 0 }
   0xe   : > { %s2565_s8 = scalar_select %p2261_p6, 1, 0 }
   0xf   : > { %p2562_p9 = scmp.eq.s32.totalorder %s2240_s25, 0  ;;  %p2268_p10 = pnand %p1572_p7, %p183_p8 }
  0x10   : > { %s2174_s10 = smov [#allocation5]   ;;  %s2175_s13 = smov [#allocation2]  }
  0x11   : > { %p1960_p11 = pneg %p2268_p10  ;;  %s208_s11 = sshll.u32 %s2174_s10, 4  ;;  %s209_s11 = int_to_ptr.vmem [resolvable:$true] %s208_s11 }
  0x12   : > { %s195_s14 = sshll.u32 %s2175_s13, 4  ;;  %s2176_s15 = smov [#allocation7]   ;;  %s196_s14 = int_to_ptr.vmem [resolvable:$true] %s195_s14 }
  0x13   : > { %p2276_p12 = pnand %p2562_p9, %p1960_p11  ;;  %s221_s16 = sshll.u32 %s2176_s15, 4  ;;  %s222_s16 = int_to_ptr.vmem [resolvable:$true] %s221_s16 }
  0x14   : > { %s2037_s17 = scalar_lea.vmem %s209_s11, 1024  ;;  %p2045_p3 = scmp.lt.s32.totalorder %s209_s11, %s209_s11 }
  0x15   : > { %p2028_p13 = pneg %p2276_p12  ;;  %p2038_p0 = scmp.ne.s32.totalorder %s209_s11, %s2037_s17 }
  0x16   : > { %p2046_p4 = scmp.lt.s32.totalorder %s2037_s17, %s2037_s17 }
  0x17   : > { %p2040_p1 = pnand %p2038_p0, %p2028_p13 }
  0x18   : > { %p2047_p7 = por %p2046_p4, %p2045_p3 }
  0x19   : > { %p2041_p2 = pneg %p2040_p1 }
  0x1b   : > { %p2048_p8 = pnand %p2047_p7, %p2041_p2 }
  0x1d   : > { %2051 = shalt.err (!%p2048_p8)
}
  0x1e   : > { %s2177_s18 = smov 128   ;;  %s2178_s19 = smov 8  }
  0x1f   : > { %1966 = dma.hbm_to_vmem [thread:$0]  (!%p2276_p12), %s2557_s2, 1024, %s209_s11, [#allocation6], %s2177_s18, %s2177_s18, %s2178_s19  }
  0x20   : > { %s2063_s28 = scalar_lea.vmem %s196_s14, 6144  ;;  %p2071_p9 = scmp.lt.s32.totalorder %s196_s14, %s196_s14 }
  0x21   : > { %p2064_p11 = scmp.ne.s32.totalorder %s196_s14, %s2063_s28  ;;  %p2072_p6 = scmp.lt.s32.totalorder %s2063_s28, %s2063_s28 }
  0x23   : > { %p2066_p0 = pnand %p2064_p11, %p2028_p13  ;;  %p2073_p3 = por %p2072_p6, %p2071_p9 }
  0x25   : > { %p2067_p1 = pneg %p2066_p0 }
  0x27   : > { %p2074_p2 = pnand %p2073_p3, %p2067_p1 }
  0x29   : > { %2077 = shalt.err (!%p2074_p2)
}
  0x2a   : > { %1963 = dma.hbm_to_vmem [thread:$0]  (!%p2276_p12), %s2556_s1, 6144, %s196_s14, [#allocation3], %s2177_s18, %s2177_s18, %s2178_s19  }
  0x2b   : > { %s2089_s11 = scalar_lea.vmem %s222_s16, 1024  ;;  %p2097_p11 = scmp.lt.s32.totalorder %s222_s16, %s222_s16 }
  0x2c   : > { %p2090_p4 = scmp.ne.s32.totalorder %s222_s16, %s2089_s11  ;;  %p2098_p0 = scmp.lt.s32.totalorder %s2089_s11, %s2089_s11 }
  0x2e   : > { %p2092_p7 = pnand %p2090_p4, %p2028_p13  ;;  %p2099_p5 = por %p2098_p0, %p2097_p11 }
  0x30   : > { %p2093_p8 = pneg %p2092_p7 }
  0x32   : > { %p2100_p6 = pnand %p2099_p5, %p2093_p8 }
  0x34   : > { %2103 = shalt.err (!%p2100_p6)
}
  0x35   : > { %1969 = dma.hbm_to_vmem [thread:$0]  (!%p2276_p12), %s2558_s3, 1024, %s222_s16, [#allocation6], %s2177_s18, %s2177_s18, %s2178_s19  }
  0x36   : > { %252 = sbr.rel (%p2268_p10) target bundleno = 1814 (0x716), region = 44  ;;  %p2568_p9 = scmp.eq.s32.totalorder (!%p2268_p10), %s2240_s25, 0 }
  0x3b   : > { %2147 = dma.done.wait (%p2568_p9), [#allocation3], 6144   ;;  %p2569_p13 = pmov %p2568_p9 }
  0x3c   : > { %p2570_p1 = pmov %p2568_p9 }
  0x3d   : > { %2149 = vsyncadd (%p2569_p13), [#allocation3], 4294961152 }
  0x3e   : > { %2151 = dma.done.wait (%p2570_p1), [#allocation6], 2048   ;;  %p2571_p5 = pmov %p2570_p1 }
  0x3f   : > { %s1582_s12 = sshll.u32 %s2240_s25, 1  ;;  %v353_v0 = vld [vmem:[#allocation2 + $0x38] sm:$0xff]  ;;  %v352_v1 = vld [vmem:[#allocation2 + $0x30] sm:$0xff]  ;;  %v351_v2 = vld [vmem:[#allocation2 + $0x28] sm:$0xff]  ;;  %vm354_vm0 = vcmask 523264   ;;  %v2179_v26 = vmov 0.0   ;;  %v305_v35 = vlaneseq }
  0x40   : > { %2153 = vsyncadd (%p2571_p5), [#allocation6], 4294965248  ;;  %p291_p3 = scmp.lt.s32.totalorder %s1582_s12, 3  ;;  %1727 = vmatprep.subr.mxu0 %v353_v0  ;;  %v453_v3 = vld [vmem:[#allocation2 + $0xb8] sm:$0xff]  ;;  %v452_v4 = vld [vmem:[#allocation2 + $0xb0] sm:$0xff]  ;;  %vm2180_vm1 = vmmov 0  }
  0x41   : > { %1728 = vmatpush3.msra.mxu0 %v353_v0  ;;  %1746 = vmatprep.subr.mxu1 %v453_v3  ;;  %v350_v5 = vld [vmem:[#allocation2 + $0x20] sm:$0xff]  ;;  %v451_v7 = vld [vmem:[#allocation2 + $0xa8] sm:$0xff]  ;;  %v349_v8 = vld [vmem:[#allocation2 + $0x18] sm:$0xff]  ;;  %v2382_v36 = vshrl.u32 %v305_v35, 7  ;;  %vm1362_vm10 = vcmask 130048   ;;  %p2572_p12 = scmp.ne.s32.totalorder %s2564_s7, 0 }
  0x42   : > { %s2579_s12 = smov (!%p291_p3, %s1582_s12), 3  ;;  %1729 = vmatprep.subr.mxu0 %v352_v1  ;;  %1747 = vmatpush3.msra.mxu1 %v453_v3  ;;  %v450_v9 = vld [vmem:[#allocation2 + $0xa0] sm:$0xff]  ;;  %v348_v10 = vld [vmem:[#allocation2 + $0x10] sm:$0xff]  ;;  %v449_v11 = vld [vmem:[#allocation2 + $0x98] sm:$0xff] }
  0x43   : > { %s1583_s14 = sshll.u32 %s2579_s12, 3  ;;  %1730 = vmatpush3.msra.mxu0 %v352_v1  ;;  %1748 = vmatprep.subr.mxu1 %v452_v4  ;;  %v347_v12 = vld [vmem:[#allocation2 + $0x8] sm:$0xff]  ;;  %v448_v13 = vld [vmem:[#allocation2 + $0x90] sm:$0xff]  ;;  %v346_v14 = vld [vmem:[#allocation2] sm:$0xff]  ;;  %v307_v37 = vadd.s32 8, %v2382_v36  ;;  %v312_v43 = vand.u32 15, %v2382_v36 }
  0x44   : > { %s2320_s17 = scalar_lea.vmem %s2555_s0, %s1583_s14  ;;  %1731 = vmatprep.subr.mxu0 %v351_v2  ;;  %1749 = vmatpush3.msra.mxu1 %v452_v4  ;;  %v447_v15 = vld [vmem:[#allocation2 + $0x88] sm:$0xff]  ;;  %v444_v17 = vld [vmem:[#allocation2 + $0x78] sm:$0xff]  ;;  %v443_v18 = vld [vmem:[#allocation2 + $0x70] sm:$0xff]  ;;  %vm613_vm2 = vcmp.lt.s32.totalorder %v2382_v36, 7  ;;  %vm531_vm4 = vcmp.lt.s32.totalorder %v2382_v36, 1  ;;  %s287_s12 = sand.u32 1, %s2164_s22  }
  0x45   : > { %v344_v6 = vld [vmem:[%s2320_s17] sm:$0xff]  ;;  %1732 = vmatpush3.msra.mxu0 %v351_v2  ;;  %1750 = vmatprep.subr.mxu1 %v451_v7  ;;  %v345_v16 = vld [vmem:[%s2320_s17 + $0x8] sm:$0xff]  ;;  %v440_v22 = vld [vmem:[#allocation2 + $0x58] sm:$0xff]  ;;  %v319_v40 = vand.u32 15, %v307_v37  ;;  %vm332_vm5 = vcmp.ne.s32.totalorder %v312_v43, 0  ;;  %s1581_s14 = sshll.u32 %s287_s12, 5 }
  0x46   : > { %1733 = vmatprep.subr.mxu0 %v350_v5  ;;  %1743 = vmatprep.mubr.msk.f32.mxu0 %vm354_vm0, %v344_v6  ;;  %v446_v19 = vld [vmem:[#allocation2 + $0x80] sm:$0xff]  ;;  %v442_v20 = vld [vmem:[#allocation2 + $0x68] sm:$0xff]  ;;  %v439_v23 = vld [vmem:[#allocation2 + $0x50] sm:$0xff]  ;;  %v2394_v50 = vsel %vm332_vm5, 1.0, %v2179_v26  ;;  %s289_s9 = scalar_lea.vmem [#allocation8], %s1581_s14  ;;  %s1614_s17 = sshll.u32 %s2240_s25, 9 }
  0x47   : > { %1734 = vmatpush3.msra.mxu0 %v350_v5  ;;  %1751 = vmatpush3.msra.mxu1 %v451_v7  ;;  %v441_v21 = vld [vmem:[#allocation2 + $0x60] sm:$0xff]  ;;  %v438_v24 = vld [vmem:[#allocation2 + $0x48] sm:$0xff]  ;;  %v2332_v27 = vld [vmem:[#allocation5 + $0x38] sm:$0xff]  ;;  %vm339_vm3 = vcmp.ne.s32.totalorder %v319_v40, 15  ;;  %v2408_v7 = vsub.s32 0, %v2382_v36  ;;  %s1478_s16 = sshll.u32 %s289_s9, 4  ;;  %s2513_s20 = scalar_lea.hbm %s2561_s6, %s1614_s17  ;;  %s2508_s16 = int_to_ptr.vmem [resolvable:$true] %s1478_s16 }
  0x48   : > { %1735 = vmatprep.subr.mxu0 %v349_v8  ;;  %1752 = vmatprep.subr.mxu1 %v450_v9  ;;  %v437_v25 = vld [vmem:[#allocation2 + $0x40] sm:$0xff]  ;;  %v2337_v28 = vld [vmem:[#allocation5 + $0x30] sm:$0xff]  ;;  %v2343_v29 = vld [vmem:[#allocation5 + $0x28] sm:$0xff]  ;;  %v2391_v49 = vsel %vm339_vm3, 1.0, %v2179_v26  ;;  %s2515_s26 = scalar_lea.sflag [#allocation4], %s287_s12  ;;  %s2104_s28 = scalar_lea.vmem %s2508_s16, 512 }
  0x49   : > { %1736 = vmatpush3.msra.mxu0 %v349_v8  ;;  %1753 = vmatpush3.msra.mxu1 %v450_v9  ;;  %v2349_v30 = vld [vmem:[#allocation5 + $0x20] sm:$0xff]  ;;  %v2355_v31 = vld [vmem:[#allocation5 + $0x18] sm:$0xff]  ;;  %v2361_v32 = vld [vmem:[#allocation5 + $0x10] sm:$0xff]  ;;  %p2105_p10 = scmp.ne.s32.totalorder %s2508_s16, %s2104_s28  ;;  %s2181_s25 = smov [#allocation8]  }
  0x4a   : > { %1737 = vmatprep.subr.mxu0 %v348_v10  ;;  %1754 = vmatprep.subr.mxu1 %v449_v11  ;;  %v2367_v33 = vld [vmem:[#allocation5 + $0x8] sm:$0xff]  ;;  %v2373_v34 = vld [vmem:[#allocation5] sm:$0xff]  ;;  %v812_v35 = vld [vmem:[#allocation2 + $0xf0] sm:$0xff]  ;;  %s2108_s29 = sshll.u32 %s2181_s25, 4  ;;  %s2109_s29 = int_to_ptr.vmem [resolvable:$false] %s2108_s29 }
  0x4b   : > { %1738 = vmatpush3.msra.mxu0 %v348_v10  ;;  %1755 = vmatpush3.msra.mxu1 %v449_v11  ;;  %v911_v37 = vld [vmem:[#allocation2 + $0x170] sm:$0xff]  ;;  %v810_v40 = vld [vmem:[#allocation2 + $0xe0] sm:$0xff]  ;;  %v908_v43 = vld [vmem:[#allocation2 + $0x158] sm:$0xff]  ;;  %p2106_p2 = pnand %p2105_p10, %p2572_p12  ;;  %s2110_s10 = scalar_lea.vmem %s2109_s29, 1024 }
  0x4c   : > { %1739 = vmatprep.subr.mxu0 %v347_v12  ;;  %1756 = vmatprep.subr.mxu1 %v448_v13  ;;  %p2111_p7 = scmp.lt.s32.totalorder %s2508_s16, %s2109_s29  ;;  %p2112_p8 = scmp.lt.s32.totalorder %s2110_s10, %s2104_s28 }
  0x4d   : > { %1740 = vmatpush3.msra.mxu0 %v347_v12  ;;  %1757 = vmatpush3.msra.mxu1 %v448_v13  ;;  %p2107_p4 = pneg %p2106_p2 }
  0x4e   : > { %1741 = vmatprep.subr.mxu0 %v346_v14  ;;  %1758 = vmatprep.subr.mxu1 %v447_v15  ;;  %p2113_p11 = por %p2112_p8, %p2111_p7 }
  0x4f   : > { %1742 = vmatpush3.msra.mxu0 %v346_v14  ;;  %1759 = vmatpush3.msra.mxu1 %v447_v15 }
  0x50   : > { %1744 = vmatmul.mubr.msk.f32.vlgmr.msra.gmra.mxu0 %vm354_vm0, %v345_v16  ;;  %1765 = vmatprep.subr.mxu0 %v444_v17  ;;  %p2114_p0 = pnand %p2113_p11, %p2107_p4 }
  0x51   : > { %1766 = vmatpush3.msra.mxu0 %v444_v17  ;;  %1760 = vmatprep.subr.mxu1 %v446_v19 }
  0x52   : > { %1767 = vmatprep.subr.mxu0 %v443_v18  ;;  %1761 = vmatpush3.msra.mxu1 %v446_v19 }
  0x53   : > { %1768 = vmatpush3.msra.mxu0 %v443_v18  ;;  %1762 = vmatprep.mubr.msk.f32.mxu1 %vm354_vm0, %v344_v6 }
  0x54   : > { %1769 = vmatprep.subr.mxu0 %v442_v20  ;;  %1763 = vmatmul.mubr.msk.f32.vlgmr.msra.gmra.mxu1 %vm354_vm0, %v345_v16 }
  0x55   : > { %1770 = vmatpush3.msra.mxu0 %v442_v20  ;;  %1781 = vmatprep.mubr.msk.f32.mxu0 %vm354_vm0, %v344_v6 }
  0x56   : > { %1771 = vmatprep.subr.mxu0 %v441_v21  ;;  %1784 = vmatprep.subr.mxu1 %v2179_v26 }
  0x57   : > { %1772 = vmatpush3.msra.mxu0 %v441_v21  ;;  %1785 = vmatpush3.msra.mxu1 %v2332_v27 }
  0x58   : > { %1773 = vmatprep.subr.mxu0 %v440_v22  ;;  %1786 = vmatprep.subr.mxu1 %v2179_v26 }
  0x59   : > { %1774 = vmatpush3.msra.mxu0 %v440_v22  ;;  %1787 = vmatpush3.msra.mxu1 %v2337_v28 }
  0x5a   : > { %1775 = vmatprep.subr.mxu0 %v439_v23  ;;  %1788 = vmatprep.subr.mxu1 %v2179_v26 }
  0x5b   : > { %1776 = vmatpush3.msra.mxu0 %v439_v23  ;;  %1789 = vmatpush3.msra.mxu1 %v2343_v29 }
  0x5c   : > { %1777 = vmatprep.subr.mxu0 %v438_v24  ;;  %1790 = vmatprep.subr.mxu1 %v2179_v26 }
  0x5d   : > { %1778 = vmatpush3.msra.mxu0 %v438_v24  ;;  %1791 = vmatpush3.msra.mxu1 %v2349_v30  ;;  %v813_v24 = vld [vmem:[#allocation2 + $0xf8] sm:$0xff] }
  0x5e   : > { %1779 = vmatprep.subr.mxu0 %v437_v25  ;;  %1792 = vmatprep.subr.mxu1 %v2179_v26 }
  0x5f   : > { %1780 = vmatpush3.msra.mxu0 %v437_v25  ;;  %1793 = vmatpush3.msra.mxu1 %v2355_v31  ;;  %v912_v25 = vld [vmem:[#allocation2 + $0x178] sm:$0xff] }
  0x60   : > { %1782 = vmatmul.mubr.msk.f32.vlgmr.msra.gmra.mxu0 %vm354_vm0, %v345_v16  ;;  %1803 = vmatprep.subr.mxu0 %v2179_v26 }
  0x61   : > { %1804 = vmatpush3.msra.mxu0 %v2332_v27  ;;  %1794 = vmatprep.subr.mxu1 %v2179_v26 }
  0x62   : > { %1805 = vmatprep.subr.mxu0 %v2179_v26  ;;  %1795 = vmatpush3.msra.mxu1 %v2361_v32 }
  0x63   : > { %1806 = vmatpush3.msra.mxu0 %v2337_v28  ;;  %1796 = vmatprep.subr.mxu1 %v2179_v26 }
  0x64   : > { %1807 = vmatprep.subr.mxu0 %v2179_v26  ;;  %1797 = vmatpush3.msra.mxu1 %v2367_v33 }
  0x65   : > { %1808 = vmatpush3.msra.mxu0 %v2343_v29  ;;  %1798 = vmatprep.subr.mxu1 %v2179_v26 }
  0x66   : > { %1809 = vmatprep.subr.mxu0 %v2179_v26  ;;  %1799 = vmatpush3.msra.mxu1 %v2373_v34 }
  0x67   : > { %1810 = vmatpush3.msra.mxu0 %v2349_v30  ;;  %1800 = vmatprep.mubr.msk.f32.mxu1 %vm2180_vm1, %v2179_v26 }
  0x68   : > { %1811 = vmatprep.subr.mxu0 %v2179_v26  ;;  %1819 = vmatprep.mubr.msk.f32.mxu0 %vm2180_vm1, %v2179_v26 }
  0x69   : > { %1812 = vmatpush3.msra.mxu0 %v2355_v31  ;;  %1822 = vmatprep.subr.mxu1 %v813_v24 }
  0x6a   : > { %1813 = vmatprep.subr.mxu0 %v2179_v26 }
  0x6b   : > { %1814 = vmatpush3.msra.mxu0 %v2361_v32 }
  0x6c   : > { %1815 = vmatprep.subr.mxu0 %v2179_v26 }
  0x6d   : > { %1816 = vmatpush3.msra.mxu0 %v2367_v33 }
  0x6e   : > { %1817 = vmatprep.subr.mxu0 %v2179_v26 }
  0x6f   : > { %1818 = vmatpush3.msra.mxu0 %v2373_v34 }
  0x70   : > { %1841 = vmatprep.subr.mxu0 %v912_v25 }
 0x110   : > { %v1745_v38 = vpop.f32.mrf.mxu0 }
 0x111   : > { %v530_v46 = vrot.slane %v1745_v38, 7  ;;  %v811_v38 = vld [vmem:[#allocation2 + $0xe8] sm:$0xff] }
 0x112   : > { %v427_v41 = vpop.f32.mrf.mxu0 }
 0x113   : > { %v529_v47 = vrot.slane %v427_v41, 7  ;;  %v909_v41 = vld [vmem:[#allocation2 + $0x160] sm:$0xff] }
 0x114   : > { %v1764_v39 = vpop.f32.mrf.mxu1 }
 0x115   : > { %v612_v44 = vrot.slane %v1764_v39, 1  ;;  %v533_v51 = vsel %vm531_vm4, %v530_v46, %v529_v47  ;;  %v532_v53 = vsel %vm531_vm4, %v529_v47, %v530_v46  ;;  %v910_v39 = vld [vmem:[#allocation2 + $0x168] sm:$0xff] }
 0x116   : > { %v520_v42 = vpop.f32.mrf.mxu1  ;;  %v534_v56 = vmul.f32 %v2394_v50, %v533_v51  ;;  %v807_v46 = vld [vmem:[#allocation2 + $0xc8] sm:$0xff]  ;;  %v905_v51 = vld [vmem:[#allocation2 + $0x140] sm:$0xff] }
 0x117   : > { %v611_v45 = vrot.slane %v520_v42, 1  ;;  %v809_v42 = vld [vmem:[#allocation2 + $0xd8] sm:$0xff]  ;;  %v906_v47 = vld [vmem:[#allocation2 + $0x148] sm:$0xff] }
 0x119   : > { %v615_v48 = vsel %vm613_vm2, %v612_v44, %v611_v45  ;;  %v614_v60 = vsel %vm613_vm2, %v611_v45, %v612_v44  ;;  %v808_v44 = vld [vmem:[#allocation2 + $0xd0] sm:$0xff] }
 0x11a   : > { %v617_v52 = vmul.f32 %v2391_v49, %v615_v48  ;;  %v907_v45 = vld [vmem:[#allocation2 + $0x150] sm:$0xff]  ;;  %v806_v48 = vld [vmem:[#allocation2 + $0xc0] sm:$0xff] }
 0x120   : > { %v1783_v54 = vpop.f32.mrf.mxu0 }
 0x121   : > { %v608_v55 = vadd.f32 %v1783_v54, %v532_v53 }
 0x122   : > { %v602_v57 = vpop.f32.mrf.mxu0 }
 0x123   : > { %v619_v58 = vadd.f32 %v617_v52, %v608_v55  ;;  %v603_v59 = vadd.f32 %v602_v57, %v534_v56  ;;  %v903_v52 = vld [vmem:[#allocation2 + $0x138] sm:$0xff] }
 0x125   : > { %v618_v61 = vadd.f32 %v614_v60, %v603_v59  ;;  %v621_v62 = vsel %vm354_vm0, %v619_v58, 0.0 }
 0x127   : > { %v620_v63 = vsel %vm354_vm0, %v618_v61, 0.0 }
 0x128   : > { %v622_v0 = vadd.f32 %v621_v62, %v620_v63 }
 0x12a   : > { %v623_v1 = vrot.slane %v622_v0, 4 }
 0x12c   : > { %v624_v2 = vadd.f32 %v623_v1, %v622_v0  ;;  %v902_v0 = vld [vmem:[#allocation2 + $0x130] sm:$0xff]  ;;  %v901_v1 = vld [vmem:[#allocation2 + $0x128] sm:$0xff] }
 0x12e   : > { %v625_v3 = vrot.slane %v624_v2, 2 }
 0x130   : > { %v626_v4 = vadd.f32 %v625_v3, %v624_v2  ;;  %v900_v2 = vld [vmem:[#allocation2 + $0x120] sm:$0xff]  ;;  %v899_v3 = vld [vmem:[#allocation2 + $0x118] sm:$0xff] }
 0x132   : > { %v627_v5 = vrot.slane %v626_v4, 1 }
 0x134   : > { %v628_v6 = vadd.f32 %v627_v5, %v626_v4  ;;  %v898_v4 = vld [vmem:[#allocation2 + $0x110] sm:$0xff]  ;;  %v897_v5 = vld [vmem:[#allocation2 + $0x108] sm:$0xff] }
 0x136   : > { %1801 = vmatmul.mubr.msk.f32.vlgmr.msra.gmra.mxu1 %vm354_vm0, %v628_v6  ;;  %v896_v6 = vld [vmem:[#allocation2 + $0x100] sm:$0xff] }
 0x137   : > { %1823 = vmatpush3.msra.mxu1 %v813_v24 }
 0x138   : > { %1824 = vmatprep.subr.mxu1 %v812_v35 }
 0x139   : > { %1825 = vmatpush3.msra.mxu1 %v812_v35 }
 0x13a   : > { %1826 = vmatprep.subr.mxu1 %v811_v38 }
 0x13b   : > { %1827 = vmatpush3.msra.mxu1 %v811_v38 }
 0x13c   : > { %1828 = vmatprep.subr.mxu1 %v810_v40 }
 0x13d   : > { %1829 = vmatpush3.msra.mxu1 %v810_v40 }
 0x13e   : > { %1830 = vmatprep.subr.mxu1 %v809_v42 }
 0x13f   : > { %1831 = vmatpush3.msra.mxu1 %v809_v42 }
 0x140   : > { %1832 = vmatprep.subr.mxu1 %v808_v44 }
 0x141   : > { %1833 = vmatpush3.msra.mxu1 %v808_v44 }
 0x142   : > { %1834 = vmatprep.subr.mxu1 %v807_v46 }
 0x143   : > { %1835 = vmatpush3.msra.mxu1 %v807_v46 }
 0x144   : > { %1836 = vmatprep.subr.mxu1 %v806_v48 }
 0x145   : > { %1837 = vmatpush3.msra.mxu1 %v806_v48 }
 0x146   : > { %1860 = vmatprep.subr.mxu1 %v903_v52 }
 0x1f6   : > { %v698_v8 = vpop.f32.mrf.mxu1 }
 0x1f7   : > { %v705_v9 = vrot.slane %v698_v8, %v2408_v7 }
 0x1f8   : > { %v1802_v10 = vpop.f32.mrf.mxu1 }
 0x1f9   : > { %v2411_v11 = vsub.f32 %v618_v61, %v705_v9  ;;  %v2413_v12 = vsub.f32 %v619_v58, %v705_v9 }
 0x1fb   : > { %v708_v13 = vmul.f32 %v2411_v11, %v2411_v11  ;;  %v709_v14 = vmul.f32 %v2413_v12, %v2413_v12 }
 0x1fd   : > { %v710_v15 = vsel %vm354_vm0, %v708_v13, 0.0  ;;  %v711_v16 = vsel %vm354_vm0, %v709_v14, 0.0 }
 0x1fe   : > { %v712_v17 = vadd.f32 %v711_v16, %v710_v15 }
 0x200   : > { %v713_v18 = vrot.slane %v712_v17, 4 }
 0x202   : > { %v714_v19 = vadd.f32 %v713_v18, %v712_v17 }
 0x204   : > { %v715_v20 = vrot.slane %v714_v19, 2 }
 0x206   : > { %v716_v21 = vadd.f32 %v715_v20, %v714_v19 }
 0x208   : > { %v717_v22 = vrot.slane %v716_v21, 1 }
 0x20a   : > { %v718_v23 = vadd.f32 %v717_v22, %v716_v21 }
 0x20c   : > { %1820 = vmatmul.mubr.msk.f32.vlgmr.msra.gmra.mxu0 %vm354_vm0, %v718_v23 }
 0x20d   : > { %1842 = vmatpush3.msra.mxu0 %v912_v25 }
 0x20e   : > { %1843 = vmatprep.subr.mxu0 %v911_v37 }
 0x20f   : > { %1844 = vmatpush3.msra.mxu0 %v911_v37 }
 0x210   : > { %1845 = vmatprep.subr.mxu0 %v910_v39 }
 0x211   : > { %1846 = vmatpush3.msra.mxu0 %v910_v39 }
 0x212   : > { %1847 = vmatprep.subr.mxu0 %v909_v41 }
 0x213   : > { %1848 = vmatpush3.msra.mxu0 %v909_v41 }
 0x214   : > { %1849 = vmatprep.subr.mxu0 %v908_v43 }
 0x215   : > { %1850 = vmatpush3.msra.mxu0 %v908_v43 }
 0x216   : > { %1851 = vmatprep.subr.mxu0 %v907_v45 }
 0x217   : > { %1852 = vmatpush3.msra.mxu0 %v907_v45 }
 0x218   : > { %1853 = vmatprep.subr.mxu0 %v906_v47 }
 0x219   : > { %1854 = vmatpush3.msra.mxu0 %v906_v47 }
 0x21a   : > { %1855 = vmatprep.subr.mxu0 %v905_v51 }
 0x21b   : > { %1856 = vmatpush3.msra.mxu0 %v905_v51 }
 0x21c   : > { %1879 = vmatprep.subr.mxu0 %v2179_v26 }
 0x2cc   : > { %v788_v53 = vpop.f32.mrf.mxu0 }
 0x2cd   : > { %v789_v54 = vadd.f32 1e-05, %v788_v53  ;;  %v1269_v53 = vld [vmem:[#allocation7 + $0x38] sm:$0xff] }
 0x2ce   : > { %v1821_v55 = vpop.f32.mrf.mxu0 }
 0x2cf   : > { %2022 = vrsqrt.f32 %v789_v54  ;;  %v1268_v54 = vld [vmem:[#allocation7 + $0x30] sm:$0xff]  ;;  %v1267_v55 = vld [vmem:[#allocation7 + $0x28] sm:$0xff] }
 0x2dc   : > { %v2023_v56 = vpop.eup %2022 }
 0x2dd   : > { %v796_v57 = vrot.slane %v2023_v56, %v2408_v7  ;;  %v1266_v56 = vld [vmem:[#allocation7 + $0x20] sm:$0xff] }
 0x2df   : > { %v797_v58 = vmul.f32 %v796_v57, %v2411_v11  ;;  %v798_v59 = vmul.f32 %v796_v57, %v2413_v12  ;;  %v1265_v57 = vld [vmem:[#allocation7 + $0x18] sm:$0xff] }
 0x2e1   : > { %vm799_vm6 = vcmp.ge.f32.partialorder %v797_v58, 0.0  ;;  %v801_v60 = vmul.f32 0.2, %v797_v58  ;;  %vm800_vm7 = vcmp.ge.f32.partialorder %v798_v59, 0.0  ;;  %v802_v61 = vmul.f32 0.2, %v798_v59 }
 0x2e3   : > { %v803_v62 = vsel %vm799_vm6, %v797_v58, %v801_v60  ;;  %v804_v63 = vsel %vm800_vm7, %v798_v59, %v802_v61  ;;  %v1264_v58 = vld [vmem:[#allocation7 + $0x10] sm:$0xff]  ;;  %v1263_v59 = vld [vmem:[#allocation7 + $0x8] sm:$0xff]  ;;  %v1262_v60 = vld [vmem:[#allocation7] sm:$0xff] }
 0x2e4   : > { %1838 = vmatprep.mubr.msk.f32.mxu1 %vm354_vm0, %v803_v62  ;;  %1857 = vmatprep.mubr.msk.f32.mxu0 %vm354_vm0, %v803_v62 }
 0x2e5   : > { %1839 = vmatmul.mubr.msk.f32.vlgmr.msra.gmra.mxu1 %vm354_vm0, %v804_v63  ;;  %1858 = vmatmul.mubr.msk.f32.vlgmr.msra.gmra.mxu0 %vm354_vm0, %v804_v63 }
 0x2e6   : > { %1861 = vmatpush3.msra.mxu1 %v903_v52  ;;  %1876 = vmatprep.mubr.msk.f32.mxu1 %vm354_vm0, %v803_v62 }
 0x2e7   : > { %1862 = vmatprep.subr.mxu1 %v902_v0  ;;  %1880 = vmatpush3.msra.mxu0 %v2332_v27 }
 0x2e8   : > { %1863 = vmatpush3.msra.mxu1 %v902_v0  ;;  %1881 = vmatprep.subr.mxu0 %v2179_v26 }
 0x2e9   : > { %1864 = vmatprep.subr.mxu1 %v901_v1  ;;  %1882 = vmatpush3.msra.mxu0 %v2337_v28 }
 0x2ea   : > { %1865 = vmatpush3.msra.mxu1 %v901_v1  ;;  %1883 = vmatprep.subr.mxu0 %v2179_v26 }
 0x2eb   : > { %1866 = vmatprep.subr.mxu1 %v900_v2  ;;  %1884 = vmatpush3.msra.mxu0 %v2343_v29 }
 0x2ec   : > { %1867 = vmatpush3.msra.mxu1 %v900_v2  ;;  %1885 = vmatprep.subr.mxu0 %v2179_v26 }
 0x2ed   : > { %1868 = vmatprep.subr.mxu1 %v899_v3  ;;  %1886 = vmatpush3.msra.mxu0 %v2349_v30 }
 0x2ee   : > { %1869 = vmatpush3.msra.mxu1 %v899_v3  ;;  %1887 = vmatprep.subr.mxu0 %v2179_v26 }
 0x2ef   : > { %1870 = vmatprep.subr.mxu1 %v898_v4  ;;  %1888 = vmatpush3.msra.mxu0 %v2355_v31 }
 0x2f0   : > { %1871 = vmatpush3.msra.mxu1 %v898_v4  ;;  %1889 = vmatprep.subr.mxu0 %v2179_v26 }
 0x2f1   : > { %1872 = vmatprep.subr.mxu1 %v897_v5  ;;  %1890 = vmatpush3.msra.mxu0 %v2361_v32 }
 0x2f2   : > { %1873 = vmatpush3.msra.mxu1 %v897_v5  ;;  %1891 = vmatprep.subr.mxu0 %v2179_v26 }
 0x2f3   : > { %1874 = vmatprep.subr.mxu1 %v896_v6  ;;  %1892 = vmatpush3.msra.mxu0 %v2367_v33 }
 0x2f4   : > { %1875 = vmatpush3.msra.mxu1 %v896_v6  ;;  %1893 = vmatprep.subr.mxu0 %v2179_v26 }
 0x2f5   : > { %1877 = vmatmul.mubr.msk.f32.vlgmr.msra.gmra.mxu1 %vm354_vm0, %v804_v63  ;;  %1894 = vmatpush3.msra.mxu0 %v2373_v34 }
 0x2f6   : > { %1895 = vmatprep.mubr.msk.f32.mxu0 %vm2180_vm1, %v2179_v26  ;;  %1898 = vmatprep.subr.mxu1 %v2179_v26 }
 0x2f7   : > { %1899 = vmatpush3.msra.mxu1 %v2332_v27  ;;  %1914 = vmatprep.mubr.msk.f32.mxu1 %vm2180_vm1, %v2179_v26 }
 0x2f8   : > { %1900 = vmatprep.subr.mxu1 %v2179_v26  ;;  %1917 = vmatprep.subr.mxu0 %v1269_v53 }
 0x2f9   : > { %1901 = vmatpush3.msra.mxu1 %v2337_v28 }
 0x2fa   : > { %1902 = vmatprep.subr.mxu1 %v2179_v26 }
 0x2fb   : > { %1903 = vmatpush3.msra.mxu1 %v2343_v29 }
 0x2fc   : > { %1904 = vmatprep.subr.mxu1 %v2179_v26 }
 0x2fd   : > { %1905 = vmatpush3.msra.mxu1 %v2349_v30 }
 0x2fe   : > { %1906 = vmatprep.subr.mxu1 %v2179_v26 }
 0x2ff   : > { %1907 = vmatpush3.msra.mxu1 %v2355_v31 }
 0x300   : > { %1908 = vmatprep.subr.mxu1 %v2179_v26 }
 0x301   : > { %1909 = vmatpush3.msra.mxu1 %v2361_v32 }
 0x302   : > { %1910 = vmatprep.subr.mxu1 %v2179_v26 }
 0x303   : > { %1911 = vmatpush3.msra.mxu1 %v2367_v33 }
 0x304   : > { %1912 = vmatprep.subr.mxu1 %v2179_v26 }
 0x305   : > { %1913 = vmatpush3.msra.mxu1 %v2373_v34 }
 0x3a5   : > { %v1840_v27 = vpop.f32.mrf.mxu1  ;;  %v1859_v28 = vpop.f32.mrf.mxu0 }
 0x3a6   : > { %v989_v10 = vrot.slane %v1840_v27, 7  ;;  %v1070_v31 = vrot.slane %v1859_v28, 1  ;;  %v1358_v28 = vld [vmem:[%s2560_s5] sm:$0xff] }
 0x3a7   : > { %v886_v29 = vpop.f32.mrf.mxu1  ;;  %v979_v30 = vpop.f32.mrf.mxu0 }
 0x3a8   : > { %v988_v8 = vrot.slane %v886_v29, 7  ;;  %v1069_v9 = vrot.slane %v979_v30, 1 }
 0x3aa   : > { %v1072_v11 = vsel %vm613_vm2, %v1070_v31, %v1069_v9  ;;  %v991_v32 = vsel %vm531_vm4, %v989_v10, %v988_v8  ;;  %v990_v33 = vsel %vm531_vm4, %v988_v8, %v989_v10  ;;  %v1071_v17 = vsel %vm613_vm2, %v1069_v9, %v1070_v31  ;;  %v1359_v10 = vld [vmem:[%s2560_s5 + $0x8] sm:$0xff]  ;;  %v1360_v31 = vld [vmem:[%s2560_s5 + $0x10] sm:$0xff] }
 0x3ab   : > { %v1074_v34 = vmul.f32 %v2391_v49, %v1072_v11  ;;  %v992_v13 = vmul.f32 %v2394_v50, %v991_v32  ;;  %v1361_v11 = vld [vmem:[%s2560_s5 + $0x18] sm:$0xff] }
 0x3b5   : > { %v1878_v26 = vpop.f32.mrf.mxu1 }
 0x3b6   : > { %v1066_v12 = vadd.f32 %v1878_v26, %v990_v33 }
 0x3b7   : > { %v1060_v14 = vpop.f32.mrf.mxu1 }
 0x3b8   : > { %v1076_v15 = vadd.f32 %v1074_v34, %v1066_v12  ;;  %v1061_v16 = vadd.f32 %v1060_v14, %v992_v13 }
 0x3ba   : > { %v1075_v18 = vadd.f32 %v1071_v17, %v1061_v16  ;;  %v1078_v19 = vsel %vm354_vm0, %v1076_v15, 0.0 }
 0x3bc   : > { %v1077_v20 = vsel %vm354_vm0, %v1075_v18, 0.0 }
 0x3bd   : > { %v1079_v21 = vadd.f32 %v1078_v19, %v1077_v20 }
 0x3bf   : > { %v1080_v22 = vrot.slane %v1079_v21, 4 }
 0x3c1   : > { %v1081_v23 = vadd.f32 %v1080_v22, %v1079_v21 }
 0x3c3   : > { %v1082_v24 = vrot.slane %v1081_v23, 2 }
 0x3c5   : > { %v1083_v25 = vadd.f32 %v1082_v24, %v1081_v23 }
 0x3c7   : > { %v1084_v35 = vrot.slane %v1083_v25, 1 }
 0x3c9   : > { %v1085_v49 = vadd.f32 %v1084_v35, %v1083_v25 }
 0x3cb   : > { %1896 = vmatmul.mubr.msk.f32.vlgmr.msra.gmra.mxu0 %vm354_vm0, %v1085_v49 }
 0x3cc   : > { %1918 = vmatpush3.msra.mxu0 %v1269_v53 }
 0x3cd   : > { %1919 = vmatprep.subr.mxu0 %v1268_v54 }
 0x3ce   : > { %1920 = vmatpush3.msra.mxu0 %v1268_v54 }
 0x3cf   : > { %1921 = vmatprep.subr.mxu0 %v1267_v55 }
 0x3d0   : > { %1922 = vmatpush3.msra.mxu0 %v1267_v55 }
 0x3d1   : > { %1923 = vmatprep.subr.mxu0 %v1266_v56 }
 0x3d2   : > { %1924 = vmatpush3.msra.mxu0 %v1266_v56 }
 0x3d3   : > { %1925 = vmatprep.subr.mxu0 %v1265_v57 }
 0x3d4   : > { %1926 = vmatpush3.msra.mxu0 %v1265_v57 }
 0x3d5   : > { %1927 = vmatprep.subr.mxu0 %v1264_v58 }
 0x3d6   : > { %1928 = vmatpush3.msra.mxu0 %v1264_v58 }
 0x3d7   : > { %1929 = vmatprep.subr.mxu0 %v1263_v59 }
 0x3d8   : > { %1930 = vmatpush3.msra.mxu0 %v1263_v59 }
 0x3d9   : > { %1931 = vmatprep.subr.mxu0 %v1262_v60 }
 0x3da   : > { %1932 = vmatpush3.msra.mxu0 %v1262_v60 }
 0x48b   : > { %v1155_v50 = vpop.f32.mrf.mxu0 }
 0x48c   : > { %v1162_v37 = vrot.slane %v1155_v50, %v2408_v7 }
 0x48d   : > { %v1897_v38 = vpop.f32.mrf.mxu0 }
 0x48e   : > { %v1163_v36 = vsub.f32 %v1075_v18, %v1162_v37  ;;  %v1164_v39 = vsub.f32 %v1076_v15, %v1162_v37 }
 0x490   : > { %v1165_v40 = vmul.f32 %v1163_v36, %v1163_v36  ;;  %v1166_v41 = vmul.f32 %v1164_v39, %v1164_v39 }
 0x492   : > { %v1167_v42 = vsel %vm354_vm0, %v1165_v40, 0.0  ;;  %v1168_v43 = vsel %vm354_vm0, %v1166_v41, 0.0 }
 0x493   : > { %v1169_v44 = vadd.f32 %v1168_v43, %v1167_v42 }
 0x495   : > { %v1170_v45 = vrot.slane %v1169_v44, 4 }
 0x497   : > { %v1171_v46 = vadd.f32 %v1170_v45, %v1169_v44 }
 0x499   : > { %v1172_v47 = vrot.slane %v1171_v46, 2 }
 0x49b   : > { %v1173_v48 = vadd.f32 %v1172_v47, %v1171_v46 }
 0x49d   : > { %v1174_v51 = vrot.slane %v1173_v48, 1 }
 0x49f   : > { %v1175_v52 = vadd.f32 %v1174_v51, %v1173_v48 }
 0x4a1   : > { %1915 = vmatmul.mubr.msk.f32.vlgmr.msra.gmra.mxu1 %vm354_vm0, %v1175_v52 }
 0x4a2   : > { %1940 = vmatprep.mubr.msk.f32.mxu1 %vm1362_vm10, %v1358_v28 }
 0x561   : > { %v1245_v61 = vpop.f32.mrf.mxu1 }
 0x562   : > { %v1246_v62 = vadd.f32 1e-05, %v1245_v61 }
 0x563   : > { %v1916_v63 = vpop.f32.mrf.mxu1 }
 0x564   : > { %2024 = vrsqrt.f32 %v1246_v62 }
 0x571   : > { %v2025_v0 = vpop.eup %2024 }
 0x572   : > { %v1253_v1 = vrot.slane %v2025_v0, %v2408_v7  ;;  %v1602_v7 = vld [vmem:[%s2559_s4] ss:$0 sm:$0xff] }
 0x574   : > { %v1254_v2 = vmul.f32 %v1253_v1, %v1163_v36  ;;  %v1255_v3 = vmul.f32 %v1253_v1, %v1164_v39 }
 0x576   : > { %vm1256_vm8 = vcmp.ge.f32.partialorder %v1254_v2, 0.0  ;;  %v1258_v4 = vmul.f32 0.2, %v1254_v2  ;;  %vm1257_vm9 = vcmp.ge.f32.partialorder %v1255_v3, 0.0  ;;  %v1259_v5 = vmul.f32 0.2, %v1255_v3 }
 0x578   : > { %v1260_v6 = vsel %vm1256_vm8, %v1254_v2, %v1258_v4  ;;  %v1261_v27 = vsel %vm1257_vm9, %v1255_v3, %v1259_v5 }
 0x579   : > { %1933 = vmatprep.mubr.msk.f32.mxu0 %vm354_vm0, %v1260_v6 }
 0x57a   : > { %1934 = vmatmul.mubr.msk.f32.vlgmr.msra.gmra.mxu0 %vm354_vm0, %v1261_v27 }
 0x63a   : > { %v1935_v29 = vpop.f32.mrf.mxu0 }
 0x63b   : > { %v1355_v30 = vadd.f32 %v1935_v29, %v1602_v7 }
 0x63c   : > { %v1349_v8 = vpop.f32.mrf.mxu0 }
 0x63d   : > { %v1350_v9 = vadd.f32 %v1602_v7, %v1349_v8  ;;  %1936 = vmatprep.subr.mxu1 %v1355_v30 }
 0x63e   : > { %1937 = vmatpush3.msra.mxu1 %v1355_v30 }
 0x63f   : > { %1938 = vmatprep.subr.mxu1 %v1350_v9 }
 0x640   : > { %1939 = vmatpush3.msra.mxu1 %v1350_v9 }
 0x641   : > { %1941 = vmatmul.mubr.msk.f32.vlgmr.msra.gmra.mxu1 %vm1362_vm10, %v1359_v10 }
 0x642   : > { %1943 = vmatprep.mubr.msk.f32.mxu1 %vm1362_vm10, %v1360_v31 }
 0x645   : > { %1944 = vmatmul.mubr.msk.f32.gmra.mxu1 %vm1362_vm10, %v1361_v11 }
 0x701   : > { %v1942_v32 = vpop.f32.mrf.mxu1 }
 0x702   : > { %1461 = vst [vmem:[%s289_s9 + $0x8] sm:$0xff] %v1942_v32 }
 0x703   : > { %v1441_v33 = vpop.f32.mrf.mxu1 }
 0x704   : > { %1460 = vst [vmem:[%s289_s9] sm:$0xff] %v1441_v33 }
 0x705   : > { %v1945_v26 = vpop.f32.mrf.mxu1 }
 0x706   : > { %1463 = vst [vmem:[%s289_s9 + $0x18] sm:$0xff] %v1945_v26 }
 0x707   : > { %v1451_v12 = vpop.f32.mrf.mxu1 }
 0x708   : > { %1462 = vst [vmem:[%s289_s9 + $0x10] sm:$0xff] %v1451_v12 }
 0x709   : > { %2117 = shalt.err (!%p2114_p0)
}
 0x70a   : > { %s2118_s11 = scalar_lea.hbm %s2513_s20, 512  ;;  %s2122_s12 = scalar_lea.hbm %s2561_s6, 1024 }
 0x70b   : > { %p2119_p6 = scmp.ne.s32.totalorder %s2513_s20, %s2118_s11  ;;  %p2123_p1 = scmp.lt.s32.totalorder %s2513_s20, %s2561_s6 }
 0x70c   : > { %p2124_p5 = scmp.lt.s32.totalorder %s2122_s12, %s2118_s11 }
 0x70d   : > { %p2120_p9 = pnand %p2119_p6, %p2572_p12 }
 0x70e   : > { %p2125_p3 = por %p2124_p5, %p2123_p1 }
 0x70f   : > { %p2121_p13 = pneg %p2120_p9 }
 0x711   : > { %p2126_p10 = pnand %p2125_p3, %p2121_p13 }
 0x713   : > { %2129 = shalt.err (!%p2126_p10)
}
 0x714   : > { %s2182_s17 = smov 128   ;;  %s2183_s18 = smov 8  }
 0x715   : > { %1958 = dma.vmem_to_hbm [thread:$0]  (%p2572_p12), %s2508_s16, 512, %s2513_s20, %s2515_s26, %s2182_s17, %s2182_s17, %s2183_s18  }
 0x716 PF: > { %p1980_p2 = scmp.ge.s32.totalorder %s2172_s24, 2  ;;  %s1493_s19 = sand.u32 1, %s2160_s21  }
 0x717   : > { %p2573_p4 = scmp.ne.s32.totalorder %s2565_s8, 0  ;;  %s1494_s28 = scalar_lea.sflag [#allocation4], %s1493_s19 }
 0x719   : > { %p1971_p7 = pnand %p1980_p2, %p2573_p4 }
 0x71b   : > { %p1972_p8 = pneg %p1971_p7 }
 0x71d   : > { %2155 = dma.done.wait (%p1972_p8), %s1494_s28, 512  }
 0x71e   : > { %2157 = vsyncadd (%p1972_p8), %s1494_s28, 4294966784  ;;  %p18_p11 = scmp.ge.s32.totalorder %s2244_s27, 4   ;;  %s2574_s21 = smov %s2164_s22 }
 0x71f   : > { %s2575_s22 = smov %s2168_s23  ;;  %s2576_s23 = smov %s2255_s30 }
 0x720   : > { %s2577_s24 = smov %s2244_s27  ;;  %20 = sbr.rel (!%p18_p11) target bundleno = 5 (0x5), region = 97 }
 0x725   :  { %1499 = vsyncpa [#allocation3], 1 }
 0x726   :  { %1501 = vsyncpa [#allocation3 + $0x1], 1 }
 0x727   :  { %1502 = vsyncpa [#allocation6], 1 }
 0x728   :  { %1503 = vsyncpa [#allocation4], 1 }
 0x729   :  { %1505 = vsyncpa [#allocation4 + $0x1], 1 }

</bundles_post_ra>
